<compile_context>
chip_gen: v5e
topology: v5e:2x2
jax: 0.10.0
libtpu: 0.0.40
codegen_flags: <defaults>
</compile_context>

<pallas_src>
import jax
import jax.numpy as jnp
import numpy as np
from jax.experimental import pallas as pl
from jax.experimental.pallas import tpu as pltpu


def _round_up(x, m):
    return ((x + m - 1) // m) * m


def _vmem_params(need_bytes):
    limit = int(min(max(4 * need_bytes, 32 << 20), 48 << 20))
    return pltpu.CompilerParams(dimension_semantics=("parallel",),
                                vmem_limit_bytes=limit)


# ----------------------------------------------------------------------------
# Kernel 1: down-conv (k=2, stride=2 as one matmul) + InstanceNorm + PReLU
# xb_ref: (8*Cin, S)   wd_ref: (Cout, 8*Cin)   bd_ref: (Cout, 1)
# alpha_ref: (1, 1) in SMEM     o_ref: (Cout, S)
# ----------------------------------------------------------------------------
def down_norm_prelu_kernel(alpha_ref, xb_ref, wd_ref, bd_ref, o_ref):
    y = jnp.dot(wd_ref[...], xb_ref[...],
                preferred_element_type=jnp.float32) + bd_ref[...]
    mean = jnp.mean(y, axis=-1, keepdims=True)          # per-channel over spatial
    cen = y - mean
    var = jnp.mean(cen * cen, axis=-1, keepdims=True)
    yn = cen * jax.lax.rsqrt(var + 1e-5)
    a = alpha_ref[0, 0]
    o_ref[...] = jnp.where(yn > 0.0, yn, a * yn)


# ----------------------------------------------------------------------------
# Kernel 2 (factory): fused 5x5x5 conv (+bias) -> masked InstanceNorm -> PReLU
# per batch, computed per lane-tile as a single im2col matmul.
#   x_ref  : (c_in, x_len)  zero-padded flattened volume (padded-flat layout)
#   w_ref  : (c_out, k_pad) lane-dense weights, k = 125*c_in, zero-padded to k_pad
#   b_ref  : (c_out, 1)     m_ref: (1, l_out) validity mask
#   o_ref  : (c_out, x_len) padded-flat output with zero borders   [mid layers]
#            (c_out, l_out) output-flat, residual fused            [last layer]
#   col_ref: (k_pad, tile)  im2col VMEM scratch
# ----------------------------------------------------------------------------
def make_conv5_kernel(offsets, l_out, off2, x_len, s_valid, c_in, c_out,
                      k_pad, tile, fuse_residual):
    n_taps = len(offsets)
    k = n_taps * c_in
    n_tiles = l_out // tile
    inv_s = 1.0 / float(s_valid)
    out_base = 0 if fuse_residual else off2

    def body(a_ref, x_ref, x0_ref, w_ref, b_ref, m_ref, o_ref, col_ref):
        # Zero the padded tail rows of the im2col scratch once per batch
        # (their weight columns are zero, but uninitialized VMEM may hold NaNs).
        if k_pad > k:
            col_ref[k:, :] = jnp.zeros((k_pad - k, tile), jnp.float32)

        if not fuse_residual:
            # Write the padded-flat borders in-kernel so the next layer sees a
            # properly zero-padded volume (replaces the per-layer jnp.pad pass).
            o_ref[:, :off2] = jnp.zeros((c_out, off2), jnp.float32)
            tail = x_len - (off2 + l_out)
            if tail > 0:
                o_ref[:, off2 + l_out:] = jnp.zeros((c_out, tail), jnp.float32)

        w = w_ref[...]                                        # (c_out, k_pad), hoisted
        bias = jnp.broadcast_to(b_ref[...], (c_out, tile))    # hoisted broadcast
        a = a_ref[0, 0]
        af = a_ref[0, 1]

        # ---- pass 1: per-tile im2col matmul (register-resident per-tile acc),
        #      masked; stash raw result in the VMEM output block and accumulate
        #      per-channel sum / sum-of-squares for the instance norm ----
        ssum = jnp.zeros((c_out, 1), jnp.float32)
        ssq = jnp.zeros((c_out, 1), jnp.float32)
        for j in range(n_tiles):                              # static lane tiles
            jt = j * tile
            for t, off in enumerate(offsets):                 # 125 static taps
                col_ref[t * c_in:(t + 1) * c_in, :] = \
                    x_ref[:, off + jt:off + jt + tile]
            y = jnp.dot(w, col_ref[...],
                        preferred_element_type=jnp.float32) + bias
            ym = y * m_ref[:, jt:jt + tile]                   # zero junk voxels
            o_ref[:, out_base + jt:out_base + jt + tile] = ym
            ssum = ssum + jnp.sum(ym, axis=-1, keepdims=True)
            ssq = ssq + jnp.sum(ym * ym, axis=-1, keepdims=True)

        # ---- instance-norm statistics over the valid voxels only ----
        mean = ssum * inv_s
        var = jnp.maximum(ssq * inv_s - mean * mean, 0.0)
        rstd = jax.lax.rsqrt(var + 1e-5)

        # ---- pass 2: normalize + PReLU (+ fused final PReLU residual add) ----
        for j in range(n_tiles):
            jt = j * tile
            ym = o_ref[:, out_base + jt:out_base + jt + tile]
            m = m_ref[:, jt:jt + tile]
            yn = (ym - mean) * rstd
            yp = jnp.where(yn > 0.0, yn, a * yn)
            if fuse_residual:
                r = x0_ref[:, off2 + jt:off2 + jt + tile]     # down out, flat layout
                yf = jnp.where(yp > 0.0, yp, af * yp)
                rf = jnp.where(r > 0.0, r, af * r)
                o_ref[:, out_base + jt:out_base + jt + tile] = (yf + rf) * m
            else:
                o_ref[:, out_base + jt:out_base + jt + tile] = yp * m

    if fuse_residual:
        def kernel(a_ref, x_ref, x0_ref, w_ref, b_ref, m_ref, o_ref, col_ref):
            body(a_ref, x_ref, x0_ref, w_ref, b_ref, m_ref, o_ref, col_ref)
    else:
        def kernel(a_ref, x_ref, w_ref, b_ref, m_ref, o_ref, col_ref):
            body(a_ref, x_ref, None, w_ref, b_ref, m_ref, o_ref, col_ref)
    return kernel


# ----------------------------------------------------------------------------
# Wrapper
# ----------------------------------------------------------------------------
def encoder_block_forward(x, params):
    """x: (N, Cin, D, H, W)  ->  (N, Cout, D/2, H/2, W/2)."""
    N, Cin, D, H, W = x.shape
    wd = params["wd"]
    Cout = wd.shape[0]
    assert D % 2 == 0 and H % 2 == 0 and W % 2 == 0
    assert Cout % 8 == 0, "out_channels must be a multiple of 8 (f32 sublane tile)"
    D2, H2, W2 = D // 2, H // 2, W // 2
    S = D2 * H2 * W2
    K8 = 8 * Cin
    f32 = jnp.float32

    # ---- stride-2 block extraction (XLA glue) ----
    # TODO(synk): costs one extra HBM pass over the input; could be folded into
    # the down kernel with strided lane reads for bandwidth-critical stages.
    xb = x.reshape(N, Cin, D2, 2, H2, 2, W2, 2)
    xb = jnp.transpose(xb, (0, 1, 3, 5, 7, 2, 4, 6)).reshape(N, K8, S).astype(f32)
    wd_flat = wd.reshape(Cout, K8).astype(f32)
    bd = params["bd"].reshape(Cout, 1).astype(f32)
    a_down = jnp.asarray(params["alpha_down"], f32).reshape(1, 1)

    down_bytes = 4 * (2 * (K8 * S + Cout * K8 + Cout) + 2 * Cout * S)
    down = pl.pallas_call(
        down_norm_prelu_kernel,
        out_shape=jax.ShapeDtypeStruct((N, Cout, S), f32),
        grid=(N,),
        in_specs=[
            pl.BlockSpec(memory_space=pltpu.MemorySpace.SMEM),          # alpha
            pl.BlockSpec((None, K8, S), lambda n: (n, 0, 0)),           # x blocks
            pl.BlockSpec((Cout, K8), lambda n: (0, 0)),                 # weight
            pl.BlockSpec((Cout, 1), lambda n: (0, 0)),                  # bias
        ],
        out_specs=pl.BlockSpec((None, Cout, S), lambda n: (n, 0, 0)),
        compiler_params=_vmem_params(down_bytes),
    )(a_down, xb, wd_flat, bd)                                          # (N, Cout, S)

    # ---- padded-flat geometry for the 5x5x5 convs ----
    Dp, Hp, Wp = D2 + 4, H2 + 4, W2 + 4
    HpWp = Hp * Wp
    P = Dp * HpWp
    maxoff = 4 * HpWp + 4 * Wp + 4
    off2 = 2 * HpWp + 2 * Wp + 2
    L = (D2 - 1) * HpWp + (H2 - 1) * Wp + (W2 - 1) + 1
    L_out = _round_up(L, 128)                 # lane-dense output width
    X_len = L_out + maxoff
    K = 125 * Cout
    K_pad = _round_up(K, 128)                 # im2col contraction dim (MXU aligned)
    tile = next(t for t in (512, 384, 256, 128) if L_out % t == 0)

    # first conv-layer input: pad the down output spatially and flatten
    # (one-time glue; later layers stay in padded-flat form end to end)
    z0 = down.reshape(N, Cout, D2, H2, W2)
    z0 = jnp.pad(z0, ((0, 0), (0, 0), (2, 2), (2, 2), (2, 2))).reshape(N, Cout, P)
    z0 = jnp.pad(z0, ((0, 0), (0, 0), (0, X_len - P)))

    # validity mask over output-flat positions (shared by every layer)
    mask = jnp.zeros((Dp, Hp, Wp), f32).at[:D2, :H2, :W2].set(1.0)
    mask = jnp.pad(mask.reshape(P)[:L], (0, L_out - L)).reshape(1, L_out)

    offsets = [kd * HpWp + kh * Wp + kw
               for kd in range(5) for kh in range(5) for kw in range(5)]

    conv_bytes = 4 * (2 * (Cout * X_len + Cout * K_pad + Cout + L_out)
                      + 2 * Cout * X_len + K_pad * tile)
    mid_call = pl.pallas_call(
        make_conv5_kernel(offsets, L_out, off2, X_len, S, Cout, Cout,
                          K_pad, tile, fuse_residual=False),
        out_shape=jax.ShapeDtypeStruct((N, Cout, X_len), f32),
        grid=(N,),
        in_specs=[
            pl.BlockSpec(memory_space=pltpu.MemorySpace.SMEM),          # alphas
            pl.BlockSpec((None, Cout, X_len), lambda n: (n, 0, 0)),     # padded-flat x
            pl.BlockSpec((Cout, K_pad), lambda n: (0, 0)),              # weights
            pl.BlockSpec((Cout, 1), lambda n: (0, 0)),                  # bias
            pl.BlockSpec((1, L_out), lambda n: (0, 0)),                 # mask
        ],
        out_specs=pl.BlockSpec((None, Cout, X_len), lambda n: (n, 0, 0)),
        scratch_shapes=[pltpu.VMEM((K_pad, tile), f32)],
        compiler_params=_vmem_params(conv_bytes),
    )
    last_bytes = conv_bytes + 4 * 2 * Cout * X_len
    last_call = pl.pallas_call(
        make_conv5_kernel(offsets, L_out, off2, X_len, S, Cout, Cout,
                          K_pad, tile, fuse_residual=True),
        out_shape=jax.ShapeDtypeStruct((N, Cout, L_out), f32),
        grid=(N,),
        in_specs=[
            pl.BlockSpec(memory_space=pltpu.MemorySpace.SMEM),          # alphas
            pl.BlockSpec((None, Cout, X_len), lambda n: (n, 0, 0)),     # padded-flat x
            pl.BlockSpec((None, Cout, X_len), lambda n: (n, 0, 0)),     # residual (down)
            pl.BlockSpec((Cout, K_pad), lambda n: (0, 0)),              # weights
            pl.BlockSpec((Cout, 1), lambda n: (0, 0)),                  # bias
            pl.BlockSpec((1, L_out), lambda n: (0, 0)),                 # mask
        ],
        out_specs=pl.BlockSpec((None, Cout, L_out), lambda n: (n, 0, 0)),
        scratch_shapes=[pltpu.VMEM((K_pad, tile), f32)],
        compiler_params=_vmem_params(last_bytes),
    )

    a_final = jnp.float32(params["alpha_final"])
    num_convs = len(params["conv_w"])
    z = z0
    yflat = None
    for li, (lw, lb, la) in enumerate(zip(params["conv_w"], params["conv_b"],
                                          params["conv_alpha"])):
        # (Cout, Cin, 5,5,5) -> lane-dense (Cout, 125*Cin), zero-padded to K_pad
        wl = jnp.transpose(lw, (0, 2, 3, 4, 1)).reshape(Cout, K).astype(f32)
        wl = jnp.pad(wl, ((0, 0), (0, K_pad - K)))
        bl = lb.reshape(Cout, 1).astype(f32)
        alphas = jnp.stack([jnp.float32(la), a_final]).reshape(1, 2)
        if li + 1 < num_convs:
            z = mid_call(alphas, z, wl, bl, mask)             # (N, Cout, X_len)
        else:
            yflat = last_call(alphas, z, z0, wl, bl, mask)    # (N, Cout, L_out)

    # ---- compact extraction of the final (residual already fused) output ----
    yfull = jnp.pad(yflat, ((0, 0), (0, 0), (0, max(0, P - L_out))))[:, :, :P]
    out = yfull.reshape(N, Cout, Dp, Hp, Wp)[:, :, :D2, :H2, :W2]
    return out


# ----------------------------------------------------------------------------
# Pure-JAX reference (mirrors the PyTorch module, eval mode)
# ----------------------------------------------------------------------------
def _instance_norm(x, eps=1e-5):
    mean = jnp.mean(x, axis=(2, 3, 4), keepdims=True)
    var = jnp.mean((x - mean) ** 2, axis=(2, 3, 4), keepdims=True)
    return (x - mean) / jnp.sqrt(var + eps)


def _prelu(x, a):
    return jnp.where(x > 0, x, a * x)


def reference_forward(x, params):
    dn = jax.lax.conv_general_dilated(
        x, params["wd"], window_strides=(2, 2, 2), padding="VALID",
        dimension_numbers=("NCDHW", "OIDHW", "NCDHW"),
        precision=jax.lax.Precision.HIGHEST)
    dn = dn + params["bd"][None, :, None, None, None]
    dn = _prelu(_instance_norm(dn), params["alpha_down"])   # Dropout3d: eval identity
    z = dn
    for w, b, a in zip(params["conv_w"], params["conv_b"], params["conv_alpha"]):
        z = jax.lax.conv_general_dilated(
            z, w, window_strides=(1, 1, 1), padding=((2, 2), (2, 2), (2, 2)),
            dimension_numbers=("NCDHW", "OIDHW", "NCDHW"),
            precision=jax.lax.Precision.HIGHEST)
        z = z + b[None, :, None, None, None]
        z = _prelu(_instance_norm(z), a)
    af = params["alpha_final"]
    return _prelu(dn, af) + _prelu(z, af)


if __name__ == "__main__":
    # small shapes: in_channels=4, out_channels=8, num_convs=2, spatial 16 -> 8
    N, Cin, Cout, num_convs = 2, 4, 8, 2
    D = H = W = 16

    key = jax.random.PRNGKey(0)
    k1, k2, kx, *kc = jax.random.split(key, 3 + 2 * num_convs)
    params = {
        "wd": jax.random.normal(k1, (Cout, Cin, 2, 2, 2), jnp.float32) * 0.2,
        "bd": jax.random.normal(k2, (Cout,), jnp.float32) * 0.1,
        "alpha_down": jnp.float32(0.2),
        "conv_w": [jax.random.normal(kc[2 * i], (Cout, Cout, 5, 5, 5), jnp.float32) * 0.05
                   for i in range(num_convs)],
        "conv_b": [jax.random.normal(kc[2 * i + 1], (Cout,), jnp.float32) * 0.1
                   for i in range(num_convs)],
        "conv_alpha": [jnp.float32(0.25), jnp.float32(0.3)][:num_convs],
        "alpha_final": jnp.float32(0.15),
    }
    x = jax.random.normal(kx, (N, Cin, D, H, W), jnp.float32)

    out = jax.block_until_ready(encoder_block_forward(x, params))
    ref = jax.block_until_ready(reference_forward(x, params))

    np.testing.assert_allclose(np.asarray(out), np.asarray(ref), rtol=2e-3, atol=2e-3)
    assert out.shape == (N, Cout, D // 2, H // 2, W // 2)

    print("KERNEL_OK")
</pallas_src>

<mosaic_0001>
module attributes {stable_mosaic.version = 11 : i64} {
  func.func @down_norm_prelu_kernel(%arg0: i32, %arg1: memref<1x1xf32, #tpu.memory_space<smem>>, %arg2: memref<1x32x512xf32, #tpu.memory_space<vmem>>, %arg3: memref<8x32xf32, #tpu.memory_space<vmem>>, %arg4: memref<8x1xf32, #tpu.memory_space<vmem>>, %arg5: memref<1x8x512xf32, #tpu.memory_space<vmem>>) attributes {dimension_semantics = [#tpu.dimension_semantics<parallel>], iteration_bounds = array<i64: 2>, scalar_prefetch = 0 : i64, scratch_operands = 0 : i64, tpu.core_type = #tpu.core_type<tc>, window_params = [{transform_indices = @transform_0, window_bounds = array<i64: 1, 1>}, {transform_indices = @transform_1, window_bounds = array<i64: 1, 32, 512>}, {pipeline_mode = #tpu.pipeline_mode<synchronous>, transform_indices = @transform_2, window_bounds = array<i64: 8, 32>}, {pipeline_mode = #tpu.pipeline_mode<synchronous>, transform_indices = @transform_3, window_bounds = array<i64: 8, 1>}, {transform_indices = @transform_4, window_bounds = array<i64: 1, 8, 512>}]} {
    %c0 = arith.constant 0 : index
    %c0_0 = arith.constant 0 : index
    %0 = vector.load %arg3[%c0, %c0_0] : memref<8x32xf32, #tpu.memory_space<vmem>>, vector<8x32xf32>
    %c0_1 = arith.constant 0 : index
    %c0_2 = arith.constant 0 : index
    %c0_3 = arith.constant 0 : index
    %1 = vector.load %arg2[%c0_1, %c0_2, %c0_3] : memref<1x32x512xf32, #tpu.memory_space<vmem>>, vector<1x32x512xf32>
    %2 = vector.shape_cast %1 : vector<1x32x512xf32> to vector<32x512xf32>
    %cst = arith.constant dense<0.000000e+00> : vector<8x512xf32>
    %3 = tpu.matmul %0, %2, %cst {dimension_numbers = #tpu.dot_dimension_numbers<[1], [0], [0], [1], [0, 0, 1, 1], [], []>} : vector<8x32xf32>, vector<32x512xf32>, vector<8x512xf32> -> vector<8x512xf32>
    %c0_4 = arith.constant 0 : index
    %c0_5 = arith.constant 0 : index
    %4 = vector.load %arg4[%c0_4, %c0_5] : memref<8x1xf32, #tpu.memory_space<vmem>>, vector<8x1xf32>
    %5 = vector.broadcast %4 : vector<8x1xf32> to vector<8x512xf32>
    %6 = arith.addf %3, %5 : vector<8x512xf32>
    %cst_6 = arith.constant dense<0.000000e+00> : vector<8xf32>
    %7 = vector.multi_reduction <add>, %6, %cst_6 [1] : vector<8x512xf32> to vector<8xf32>
    %8 = vector.shape_cast %7 : vector<8xf32> to vector<8x1xf32>
    %cst_7 = arith.constant 5.120000e+02 : f32
    %9 = vector.broadcast %cst_7 : f32 to vector<8x1xf32>
    %10 = arith.divf %8, %9 : vector<8x1xf32>
    %11 = vector.broadcast %10 : vector<8x1xf32> to vector<8x512xf32>
    %12 = arith.subf %6, %11 : vector<8x512xf32>
    %13 = arith.mulf %12, %12 : vector<8x512xf32>
    %cst_8 = arith.constant dense<0.000000e+00> : vector<8xf32>
    %14 = vector.multi_reduction <add>, %13, %cst_8 [1] : vector<8x512xf32> to vector<8xf32>
    %15 = vector.shape_cast %14 : vector<8xf32> to vector<8x1xf32>
    %cst_9 = arith.constant 5.120000e+02 : f32
    %16 = vector.broadcast %cst_9 : f32 to vector<8x1xf32>
    %17 = arith.divf %15, %16 : vector<8x1xf32>
    %cst_10 = arith.constant 9.99999974E-6 : f32
    %18 = vector.broadcast %cst_10 : f32 to vector<8x1xf32>
    %19 = arith.addf %17, %18 : vector<8x1xf32>
    %20 = math.rsqrt %19 : vector<8x1xf32>
    %21 = vector.broadcast %20 : vector<8x1xf32> to vector<8x512xf32>
    %22 = arith.mulf %12, %21 : vector<8x512xf32>
    %c0_11 = arith.constant 0 : index
    %c0_12 = arith.constant 0 : index
    %23 = memref.load %arg1[%c0_11, %c0_12] : memref<1x1xf32, #tpu.memory_space<smem>>
    %cst_13 = arith.constant 0.000000e+00 : f32
    %24 = vector.broadcast %cst_13 : f32 to vector<8x512xf32>
    %25 = arith.cmpf ogt, %22, %24 : vector<8x512xf32>
    %26 = vector.broadcast %23 : f32 to vector<8x512xf32>
    %27 = arith.mulf %26, %22 : vector<8x512xf32>
    %28 = arith.select %25, %22, %27 : vector<8x512xi1>, vector<8x512xf32>
    %c0_14 = arith.constant 0 : index
    %c0_15 = arith.constant 0 : index
    %c0_16 = arith.constant 0 : index
    %29 = vector.load %arg5[%c0_14, %c0_15, %c0_16] : memref<1x8x512xf32, #tpu.memory_space<vmem>>, vector<1x8x512xf32>
    %30 = vector.shape_cast %29 : vector<1x8x512xf32> to vector<8x512xf32>
    %31 = vector.shape_cast %28 : vector<8x512xf32> to vector<1x8x512xf32>
    tpu.vector_store %arg5[%c0_14, %c0_15, %c0_16], %31 {strides = array<i32>} : memref<1x8x512xf32, #tpu.memory_space<vmem>>, vector<1x8x512xf32>,
    return
  }
  func.func @transform_0(%arg0: i32) -> (i32, i32) {
    %c0_i32 = arith.constant 0 : i32
    %c0_i32_0 = arith.constant 0 : i32
    %c0_i32_1 = arith.constant 0 : i32
    return %c0_i32, %c0_i32_0 : i32, i32
  }
  func.func @transform_1(%arg0: i32) -> (i32, i32, i32) {
    %c0_i32 = arith.constant 0 : i32
    %c0_i32_0 = arith.constant 0 : i32
    %c0_i32_1 = arith.constant 0 : i32
    return %arg0, %c0_i32, %c0_i32_0 : i32, i32, i32
  }
  func.func @transform_2(%arg0: i32) -> (i32, i32) {
    %c0_i32 = arith.constant 0 : i32
    %c0_i32_0 = arith.constant 0 : i32
    %c0_i32_1 = arith.constant 0 : i32
    return %c0_i32, %c0_i32_0 : i32, i32
  }
  func.func @transform_3(%arg0: i32) -> (i32, i32) {
    %c0_i32 = arith.constant 0 : i32
    %c0_i32_0 = arith.constant 0 : i32
    %c0_i32_1 = arith.constant 0 : i32
    return %c0_i32, %c0_i32_0 : i32, i32
  }
  func.func @transform_4(%arg0: i32) -> (i32, i32, i32) {
    %c0_i32 = arith.constant 0 : i32
    %c0_i32_0 = arith.constant 0 : i32
    %c0_i32_1 = arith.constant 0 : i32
    return %arg0, %c0_i32, %c0_i32_0 : i32, i32, i32
  }
}

</mosaic_0001>

<bundles_post_ra>
// kernel: tpu_custom_call.1
= control target key start
LH: loop header
LB: loop body
LE: loop exit
PB: predicated region body
PF: predicated region fallthrough
CT: control target
= control target key end

     0   :  { %s830_s0 = inlined_call_operand.<no memory space> [shape: f32[1,1], index: 0, kind: input, shape index: {}]   ;;  %s831_s1 = inlined_call_operand.hbm [shape: f32[2,32,512], index: 1, kind: input, shape index: {}]   ;;  %s832_s2 = inlined_call_operand.vmem [shape: f32[8,32], index: 2, kind: input, shape index: {}]   ;;  %s833_s3 = inlined_call_operand.vmem [shape: f32[8,1], index: 3, kind: input, shape index: {}]   ;;  %s834_s4 = inlined_call_operand.hbm [shape: f32[2,8,512], index: 4, kind: output, shape index: {}]  }
   0x1   :  { %9 = sst [smem:[#allocation2]] %s830_s0 }
   0x2   :  { %10 = vsyncpa [#allocation4], 0 }
   0x3   :  { %12 = vsyncpa [#allocation4 + $0x1], 0 }
   0x4   :  { %13 = vsyncpa [#allocation5], 0 }
   0x5   :  { %15 = vsyncpa [#allocation5 + $0x1], 0  ;;  %s678_s17 = smov 0   ;;  %s680_s18 = smov 0  }
   0x6   :  { %s682_s19 = smov 0   ;;  %s684_s20 = smov 0  }
   0x7 LB: > { %s699_s0 = sadd.s32 4294967295, %s644_s20   ;;  %s473_s21 = sadd.s32 4294967294, %s644_s20   ;;  %s644_s20 = sphi %s684_s20, %s844_s20   ;;  %s640_s19 = sphi %s682_s19, %s843_s19   ;;  %s636_s18 = sphi %s680_s18, %s842_s18   ;;  %s632_s17 = sphi %s678_s17, %s841_s17  }
   0x8   : > { %s703_s22 = sadd.s32 1, %s644_s20   ;;  %s49_s23 = sadd.s32 1, %s640_s19 }
   0x9   : > { %s46_s24 = ssub.s32 %s644_s20, %s703_s22  ;;  %p56_p0 = scmp.ne.s32.totalorder %s640_s19, %s636_s18 }
   0xa   : > { %p47_p1 = scmp.eq.s32.totalorder %s46_s24, 0  ;;  %p57_p2 = scmp.eq.s32.totalorder %s644_s20, 0 }
   0xb   : > { %p62_p3 = scmp.ne.s32.totalorder %s636_s18, %s632_s17  ;;  %p63_p4 = scmp.eq.s32.totalorder %s699_s0, 0 }
   0xc   : > { %s715_s25 = scalar_select %p47_p1, %s640_s19, %s49_s23  }
   0xd   : > { %p717_p5 = por %p57_p2, %p56_p0  ;;  %p721_p6 = por %p63_p4, %p62_p3 }
   0xe   : > { %p128_p7 = scmp.eq.s32.totalorder %s699_s0, 1  ;;  %p134_p8 = scmp.eq.s32.totalorder %s473_s21, 1 }
   0xf   : > { %p505_p10 = scmp.lt.s32.totalorder %s644_s20, 2  ;;  %s163_s30 = sand.u32 1, %s640_s19  }
  0x10   : > { %p728_p11 = por %p128_p7, %p56_p0  ;;  %p732_p12 = por %p134_p8, %p62_p3 }
  0x11   : > { %s491_s5 = sshll.u32 %s644_s20, 7  ;;  %s476_s6 = sshll.u32 %s163_s30, 7 }
  0x12   : > { %s172_s9 = scalar_lea.hbm %s831_s1, %s491_s5  ;;  %s167_s11 = scalar_lea.vmem [#allocation3], %s476_s6 }
  0x13   : > { %s173_s10 = sshll.u32 %s172_s9, 4  ;;  %s175_s12 = sshll.u32 %s167_s11, 4  ;;  %s174_s10 = int_to_ptr.hbm [resolvable:$true] %s173_s10  ;;  %s176_s12 = int_to_ptr.vmem [resolvable:$true] %s175_s12 }
  0x14   : > { %p743_p13 = pnand %p505_p10, %p717_p5  ;;  %p479_p0 = scmp.ge.s32.totalorder %s644_s20, 1 }
  0x15   : > { %p183_p1 = scmp.lt.s32.totalorder %s644_s20, 3  ;;  %s164_s14 = scalar_lea.sflag [#allocation4], %s163_s30 }
  0x16   : > { %s548_s15 = sshra.s32 %s174_s10, 4  ;;  %p552_p3 = pneg %p743_p13  ;;  %s549_s15 = int_to_ptr.hbm [resolvable:$true] %s548_s15 }
  0x17   : > { %s550_s16 = scalar_lea.hbm %s549_s15, 128  ;;  %s555_s24 = scalar_lea.hbm %s831_s1, 256 }
  0x18   : > { %p551_p2 = scmp.ne.s32.totalorder %s549_s15, %s550_s16  ;;  %p556_p5 = scmp.lt.s32.totalorder %s549_s15, %s831_s1 }
  0x19   : > { %p557_p8 = scmp.lt.s32.totalorder %s555_s24, %s550_s16 }
  0x1a   : > { %p553_p4 = pnand %p552_p3, %p551_p2 }
  0x1b   : > { %p558_p10 = por %p557_p8, %p556_p5 }
  0x1c   : > { %p554_p7 = pneg %p553_p4 }
  0x1e   : > { %p559_p9 = pnand %p558_p10, %p554_p7 }
  0x20   : > { %562 = shalt.err (!%p559_p9)
}
  0x21   : > { %s646_s30 = smov 512   ;;  %s647_s6 = smov 32  }
  0x22   : > { %500 = dma.hbm_to_vmem [thread:$0]  (!%p743_p13), %s174_s10, 2048, %s176_s12, %s164_s14, %s646_s30, %s646_s30, %s647_s6  }
  0x23   : > { %p184_p2 = pnand %p479_p0, %p183_p1 }
  0x24   : > { %s764_s7 = sand.u32 (!%p184_p2), 1, %s636_s18  }
  0x25   : > { %187 = sbr.rel (%p184_p2) target bundleno = 467 (0x1d3), region = 36  ;;  %s480_s8 = sshll.u32 (!%p184_p2), %s764_s7, 7 }
  0x26   : > { %s190_s9 = scalar_lea.sflag (!%p184_p2), [#allocation4], %s764_s7  ;;  %s768_s11 = scalar_lea.vmem (!%p184_p2), [#allocation3], %s480_s8 }
  0x2a   : > { %623 = dma.done.wait (%p721_p6), %s190_s9, 2048  }
  0x2b   : > { %625 = vsyncadd (%p721_p6), %s190_s9, 4294965248  ;;  %v648_v0 = vmov 0   ;;  %v234_v1 = vld [vmem:[%s768_s11 + $0x70] sm:$0xff]  ;;  %v235_v2 = vld [vmem:[%s768_s11 + $0x78] sm:$0xff]  ;;  %vm242_vm0 = vcmask 261120   ;;  %v649_v31 = vmov 512.0  }
  0x2c   : > { %543 = vset.pattern.permute.xlu0 %v648_v0  ;;  %v230_v3 = vld [vmem:[%s768_s11 + $0x50] sm:$0xff]  ;;  %298 = vmatpush.msra.mxu2 %v234_v1  ;;  %v231_v4 = vld [vmem:[%s768_s11 + $0x58] sm:$0xff]  ;;  %v232_v5 = vld [vmem:[%s768_s11 + $0x60] sm:$0xff]  ;;  %544 = vrcp.f32 %v649_v31  ;;  %s368_s14 = sld [smem:[#allocation2]]  ;;  %s481_s15 = sshll.u32 %s764_s7, 5 }
  0x2d   : > { %318 = vmatpush.msra.mxu3 %v235_v2  ;;  %v233_v6 = vld [vmem:[%s768_s11 + $0x68] sm:$0xff]  ;;  %258 = vmatpush.msra.mxu0 %v232_v5  ;;  %v226_v7 = vld [vmem:[%s768_s11 + $0x30] sm:$0xff]  ;;  %v227_v8 = vld [vmem:[%s768_s11 + $0x38] sm:$0xff]  ;;  %s492_s16 = sshll.u32 %s699_s0, 5  ;;  %s218_s0 = scalar_lea.vmem [#allocation6], %s481_s15 }
  0x2e   : > { %278 = vmatpush.msra.mxu1 %v233_v6  ;;  %v228_v9 = vld [vmem:[%s768_s11 + $0x40] sm:$0xff]  ;;  %299 = vmatpush.msra.mxu2 %v230_v3  ;;  %v229_v10 = vld [vmem:[%s768_s11 + $0x48] sm:$0xff]  ;;  %v222_v11 = vld [vmem:[%s768_s11 + $0x10] sm:$0xff]  ;;  %s398_s24 = scalar_lea.hbm %s834_s4, %s492_s16  ;;  %s400_s26 = sshll.u32 %s218_s0, 4  ;;  %s401_s26 = int_to_ptr.vmem [resolvable:$true] %s400_s26 }
  0x2f   : > { %319 = vmatpush.msra.mxu3 %v231_v4  ;;  %259 = vmatpush.msra.mxu0 %v228_v9  ;;  %v223_v12 = vld [vmem:[%s768_s11 + $0x18] sm:$0xff]  ;;  %v224_v13 = vld [vmem:[%s768_s11 + $0x20] sm:$0xff]  ;;  %v225_v14 = vld [vmem:[%s768_s11 + $0x28] sm:$0xff]  ;;  %s402_s5 = sshll.u32 %s398_s24, 4  ;;  %s387_s30 = scalar_lea.sflag [#allocation5], %s764_s7  ;;  %s403_s5 = int_to_ptr.hbm [resolvable:$true] %s402_s5 }
  0x30   : > { %279 = vmatpush.msra.mxu1 %v229_v10  ;;  %300 = vmatpush.msra.mxu2 %v226_v7  ;;  %v219_v15 = vld [vmem:[%s832_s2] sm:$0xff]  ;;  %v221_v17 = vld [vmem:[%s768_s11 + $0x8] sm:$0xff]  ;;  %s592_s6 = sshra.s32 %s403_s5, 4  ;;  %s598_s27 = scalar_lea.hbm %s834_s4, 64  ;;  %s593_s6 = int_to_ptr.hbm [resolvable:$true] %s592_s6 }
  0x31   : > { %320 = vmatpush.msra.mxu3 %v227_v8  ;;  %260 = vmatpush.msra.mxu0 %v224_v13  ;;  %v220_v16 = vld [vmem:[%s768_s11] sm:$0xff]  ;;  %s594_s8 = scalar_lea.hbm %s593_s6, 32  ;;  %p599_p0 = scmp.lt.s32.totalorder %s593_s6, %s834_s4 }
  0x32   : > { %280 = vmatpush.msra.mxu1 %v225_v14  ;;  %301 = vmatpush.msra.mxu2 %v222_v11  ;;  %v236_v18 = vld [vmem:[%s833_s3] sm:$0xff]  ;;  %v545_v32 = vpop.eup %544  ;;  %v373_v60 = vstv %s368_s14  ;;  %p595_p6 = scmp.ne.s32.totalorder %s593_s6, %s594_s8  ;;  %p600_p1 = scmp.lt.s32.totalorder %s598_s27, %s594_s8 }
  0x33   : > { %321 = vmatpush.msra.mxu3 %v223_v12  ;;  %484 = vmatmul.msk.f32.vlgmr.msra.gmra.mxu2 %vm242_vm0, %v219_v15  ;;  %v332_v33 = vmul.f32 512.0, %v545_v32  ;;  %vm336_vm1 = vweird.f32 %v545_v32 }
  0x34   : > { %485 = vmatmul.msk.f32.vlgmr.msra.gmra.mxu3 %vm242_vm0, %v219_v15  ;;  %261 = vmatpush.msra.mxu0 %v220_v16  ;;  %p596_p9 = pnand %p595_p6, %p728_p11  ;;  %p601_p3 = por %p600_p1, %p599_p0 }
  0x35   : > { %281 = vmatpush.msra.mxu1 %v221_v17  ;;  %482 = vmatmul.msk.f32.vlgmr.msra.gmra.mxu0 %vm242_vm0, %v219_v15  ;;  %v333_v34 = vsub.f32 1.0, %v332_v33 }
  0x36   : > { %483 = vmatmul.msk.f32.vlgmr.msra.gmra.mxu1 %vm242_vm0, %v219_v15  ;;  %239 = vperm.xlu0 %543, %v236_v18   ;;  %p597_p13 = pneg %p596_p9 }
  0x37   : > { %v334_v35 = vmul.f32 %v545_v32, %v333_v34 }
  0x38   : > { %p602_p4 = pnand %p601_p3, %p597_p13 }
  0x39   : > { %v335_v36 = vadd.f32 %v545_v32, %v334_v35 }
  0x3b   : > { %v337_v37 = vsel %vm336_vm1, %v545_v32, %v335_v36 }
  0xa8   : > { %v240_v19 = vpop.permute.xlu0 %239 }
  0xb2   : > { %v263_v20 = vpop.f32.mrf.mxu0 }
  0xb3   : > { %v283_v21 = vpop.f32.mrf.mxu1  ;;  %v264_v22 = vadd.f32 %v263_v20, %v240_v19 }
  0xb4   : > { %v284_v23 = vadd.f32 %v283_v21, %v240_v19 }
  0xb6   : > { %v326_v24 = vadd.f32 %v284_v23, %v264_v22  ;;  %v303_v25 = vpop.f32.mrf.mxu2 }
  0xb7   : > { %v323_v26 = vpop.f32.mrf.mxu3  ;;  %v304_v27 = vadd.f32 %v303_v25, %v240_v19 }
  0xb8   : > { %v324_v29 = vadd.f32 %v323_v26, %v240_v19 }
  0xb9   : > { %v327_v28 = vadd.f32 %v326_v24, %v304_v27 }
  0xbb   : > { %v328_v30 = vadd.f32 %v327_v28, %v324_v29 }
  0xbd   : > { %329 = vadd.xlane.f32.xlu0 %v328_v30 }
 0x130   : > { %v330_v38 = vpop.xlane.xlu0 %329 }
 0x131   : > { %v338_v39 = vmul.f32 %v337_v37, %v330_v38 }
 0x133   : > { %v339_v40 = vsub.f32 %v264_v22, %v338_v39  ;;  %v340_v41 = vsub.f32 %v284_v23, %v338_v39  ;;  %v341_v42 = vsub.f32 %v304_v27, %v338_v39  ;;  %v342_v43 = vsub.f32 %v324_v29, %v338_v39 }
 0x135   : > { %v343_v44 = vmul.f32 %v339_v40, %v339_v40  ;;  %v344_v45 = vmul.f32 %v340_v41, %v340_v41  ;;  %v345_v46 = vmul.f32 %v341_v42, %v341_v42  ;;  %v346_v48 = vmul.f32 %v342_v43, %v342_v43 }
 0x137   : > { %v347_v47 = vadd.f32 %v344_v45, %v343_v44 }
 0x139   : > { %v348_v49 = vadd.f32 %v347_v47, %v345_v46 }
 0x13b   : > { %v349_v50 = vadd.f32 %v348_v49, %v346_v48 }
 0x13d   : > { %350 = vadd.xlane.f32.xlu1 %v349_v50 }
 0x1b0   : > { %v351_v51 = vpop.xlane.xlu1 %350 }
 0x1b1   : > { %v352_v52 = vmul.f32 %v351_v51, %v337_v37 }
 0x1b3   : > { %v353_v53 = vadd.f32 1e-05, %v352_v52 }
 0x1b5   : > { %546 = vrsqrt.f32 %v353_v53  ;;  %vm360_vm3 = vweird.f32 %v353_v53 }
 0x1bb   : > { %v547_v54 = vpop.eup %546 }
 0x1bc   : > { %v355_v55 = vmul.f32 %v547_v54, %v353_v53  ;;  %vm361_vm2 = vweird.f32 %v547_v54 }
 0x1bd   : > { %vm362_vm4 = vmor %vm360_vm3, %vm361_vm2 }
 0x1be   : > { %v356_v56 = vmul.f32 %v547_v54, %v355_v55 }
 0x1c0   : > { %v357_v57 = vmul.f32 0.5, %v356_v56 }
 0x1c2   : > { %v358_v58 = vsub.f32 1.5, %v357_v57 }
 0x1c4   : > { %v359_v59 = vmul.f32 %v547_v54, %v358_v58 }
 0x1c6   : > { %v363_v61 = vsel %vm362_vm4, %v547_v54, %v359_v59 }
 0x1c7   : > { %v364_v62 = vmul.f32 %v363_v61, %v339_v40  ;;  %v365_v63 = vmul.f32 %v363_v61, %v340_v41  ;;  %v366_v0 = vmul.f32 %v363_v61, %v341_v42  ;;  %v367_v1 = vmul.f32 %v363_v61, %v342_v43 }
 0x1c9   : > { %vm369_vm5 = vcmp.gt.f32.partialorder %v364_v62, 0.0  ;;  %vm370_vm6 = vcmp.gt.f32.partialorder %v365_v63, 0.0  ;;  %vm371_vm7 = vcmp.gt.f32.partialorder %v366_v0, 0.0  ;;  %vm372_vm8 = vcmp.gt.f32.partialorder %v367_v1, 0.0 }
 0x1ca   : > { %v374_v2 = vmul.f32 %v373_v60, %v364_v62  ;;  %v375_v3 = vmul.f32 %v373_v60, %v365_v63  ;;  %v376_v4 = vmul.f32 %v373_v60, %v366_v0  ;;  %v377_v5 = vmul.f32 %v373_v60, %v367_v1 }
 0x1cc   : > { %v378_v6 = vsel %vm369_vm5, %v364_v62, %v374_v2  ;;  %v379_v7 = vsel %vm370_vm6, %v365_v63, %v375_v3  ;;  %v380_v8 = vsel %vm371_vm7, %v366_v0, %v376_v4  ;;  %v381_v9 = vsel %vm372_vm8, %v367_v1, %v377_v5 }
 0x1cd   : > { %382 = vst [vmem:[%s218_s0] sm:$0xff] %v378_v6 }
 0x1ce   : > { %383 = vst [vmem:[%s218_s0 + $0x8] sm:$0xff] %v379_v7 }
 0x1cf   : > { %384 = vst [vmem:[%s218_s0 + $0x10] sm:$0xff] %v380_v8 }
 0x1d0   : > { %385 = vst [vmem:[%s218_s0 + $0x18] sm:$0xff] %v381_v9 }
 0x1d1   : > { %605 = shalt.err (!%p602_p4)
}
 0x1d2   : > { %495 = dma.vmem_to_hbm [thread:$0]  (%p728_p11), %s401_s26, 512, %s403_s5, %s387_s30  }
 0x1d3 PF: > { %s414_s7 = sand.u32 1, %s632_s17   ;;  %p840_p7 = scmp.ge.s32.totalorder %s644_s20, 2 }
 0x1d4   : > { %s415_s13 = scalar_lea.sflag [#allocation5], %s414_s7 }
 0x1d5   : > { %p502_p5 = pnand %p840_p7, %p732_p12 }
 0x1d7   : > { %p503_p8 = pneg %p502_p5 }
 0x1d9   : > { %627 = dma.done.wait (%p503_p8), %s415_s13, 512  }
 0x1da   : > { %629 = vsyncadd (%p503_p8), %s415_s13, 4294966784  ;;  %p18_p10 = scmp.ge.s32.totalorder %s703_s22, 4   ;;  %s841_s17 = smov %s636_s18 }
 0x1db   : > { %s842_s18 = smov %s640_s19  ;;  %s843_s19 = smov %s715_s25 }
 0x1dc   : > { %s844_s20 = smov %s703_s22  ;;  %20 = sbr.rel (!%p18_p10) target bundleno = 7 (0x7), region = 81 }
 0x1e1   :  { %421 = vsyncpa [#allocation4], 1 }
 0x1e2   :  { %423 = vsyncpa [#allocation4 + $0x1], 1 }
 0x1e3   :  { %424 = vsyncpa [#allocation5], 1 }
 0x1e4   :  { %426 = vsyncpa [#allocation5 + $0x1], 1 }

</bundles_post_ra>
